<compile_context>
chip_gen: v6e
topology: v6e:2x2x1
jax: 0.10.0
libtpu: 0.0.40
codegen_flags: <defaults>
</compile_context>

<pallas_src>
import jax
import jax.numpy as jnp
from jax.experimental import pallas as pl
from jax.experimental.pallas import tpu as pltpu


_ITEM = 4  # f32 compute bytes per element


def _budgets():
    """(tile_bytes, vmem_limit_bytes): bigger tiles on 128 MiB-VMEM parts
    (v5e/v6e), conservative on v7x-class parts (64 MiB physical VMEM)."""
    try:
        kind = jax.devices()[0].device_kind.lower()
    except Exception:
        kind = ""
    if ("v5" in kind) or ("v6" in kind):
        return 4 * 1024 * 1024, 64 * 1024 * 1024
    return 2 * 1024 * 1024, 40 * 1024 * 1024


# --------------------------------------------------------------------------
# Kernels
# --------------------------------------------------------------------------

def _layernorm_last(e, gamma, beta, out_dtype):
    """LayerNorm over the last (lane) axis; single fused stats pass."""
    d = e.shape[-1]
    inv_d = 1.0 / d
    mean = jnp.sum(e, axis=-1, keepdims=True) * inv_d
    mean_sq = jnp.sum(e * e, axis=-1, keepdims=True) * inv_d
    var = jnp.maximum(mean_sq - mean * mean, 0.0)
    inv = jax.lax.rsqrt(var + 1e-5)                 # PyTorch LayerNorm eps
    return ((e - mean) * inv * gamma + beta).astype(out_dtype)


def _embed_ln_t_kernel(x_ref, pos_ref, gamma_ref, beta_ref, o_ref):
    """Etype == 'T' path.

    x_ref:     (TB, D, TM)  tile of x in its NATIVE layout (no HBM transpose)
    pos_ref:   (TM, D)      positional rows for this M tile (resident across
                            the fast B grid axis -> DMA'd once per M tile)
    gamma_ref: (1, D)       LayerNorm weight
    beta_ref:  (1, D)       LayerNorm bias
    o_ref:     (TB, TM, D)  output tile (lane axis = d_Em)
    """
    x = x_ref[...].astype(jnp.float32)
    xt = jnp.transpose(x, (0, 2, 1))                 # one batched XLU transpose
    e = xt + pos_ref[...].astype(jnp.float32)[None]
    gamma = gamma_ref[...].astype(jnp.float32)[None]  # (1, 1, D)
    beta = beta_ref[...].astype(jnp.float32)[None]
    o_ref[...] = _layernorm_last(e, gamma, beta, o_ref.dtype)
    # TODO(synk): on v7x, computing the add + LN stats in native (D-major)
    # layout before a single final transpose would further cut XLU pressure.


def _embed_ln_s_kernel(x_ref, pos_ref, gamma_ref, beta_ref, o_ref):
    """Etype != 'T' path.  x_ref/o_ref: (TL, S, D); pos_ref: (S, D)."""
    e = x_ref[...].astype(jnp.float32) + pos_ref[...].astype(jnp.float32)[None]
    gamma = gamma_ref[...].astype(jnp.float32)[None]
    beta = beta_ref[...].astype(jnp.float32)[None]
    o_ref[...] = _layernorm_last(e, gamma, beta, o_ref.dtype)


# --------------------------------------------------------------------------
# Tile-size selection (trace-time constants)
# --------------------------------------------------------------------------

def _pick_t_tiles(B, D, M, tile_bytes):
    slab = D * M * _ITEM                       # one batch element, full M
    if slab <= tile_bytes or M % 128 != 0:
        TM = M                                 # full M (common case: M small)
    else:
        TM = max(128, (tile_bytes // (D * _ITEM)) // 128 * 128)
        TM = min(TM, M)
    TB = max(1, tile_bytes // (D * TM * _ITEM))
    TB = min(TB, B)
    # Keep >= 2 grid steps on a parallel axis (v7x has 2 TensorCores).
    if pl.cdiv(M, TM) * pl.cdiv(B, TB) < 2 and B >= 2:
        TB = pl.cdiv(B, 2)
    return TB, TM


def _pick_s_tile(L, S, D, tile_bytes):
    per_row = S * D * _ITEM
    TL = max(1, tile_bytes // per_row)
    TL = min(TL, L)
    if pl.cdiv(L, TL) < 2 and L >= 2:
        TL = pl.cdiv(L, 2)
    return TL


# --------------------------------------------------------------------------
# pallas_call wrappers
# --------------------------------------------------------------------------

def _run_t_path(x, pos_table, gamma, beta, out_dtype):
    """x: (B, D, F, S) native layout; returns (B, F, S, D)."""
    B, D, F, S = x.shape
    M = F * S
    tile_bytes, vmem_bytes = _budgets()

    x_r = x.reshape(B, D, M)                       # contiguous merge, free
    # (M, D) repeat of the (S, D) table: a few KiB for DSTAGNN shapes, and it
    # is only DMA'd when the *slow* M grid axis advances (once total when
    # TM == M), so it adds ~M*D*4 bytes of HBM traffic — not one copy/step.
    pos_m = jnp.broadcast_to(pos_table[None], (F, S, D)).reshape(M, D)

    TB, TM = _pick_t_tiles(B, D, M, tile_bytes)
    grid = (pl.cdiv(M, TM), pl.cdiv(B, TB))        # B innermost -> pos resident

    out = pl.pallas_call(
        _embed_ln_t_kernel,
        out_shape=jax.ShapeDtypeStruct((B, M, D), out_dtype),
        grid_spec=pltpu.PrefetchScalarGridSpec(
            num_scalar_prefetch=0,
            grid=grid,
            in_specs=[
                pl.BlockSpec((TB, D, TM), lambda mi, bi: (bi, 0, mi)),
                pl.BlockSpec((TM, D), lambda mi, bi: (mi, 0)),
                pl.BlockSpec((1, D), lambda mi, bi: (0, 0)),
                pl.BlockSpec((1, D), lambda mi, bi: (0, 0)),
            ],
            out_specs=pl.BlockSpec((TB, TM, D), lambda mi, bi: (bi, mi, 0)),
        ),
        compiler_params=pltpu.CompilerParams(
            dimension_semantics=("parallel", "parallel"),
            vmem_limit_bytes=vmem_bytes),
    )(x_r, pos_m, gamma, beta)
    return out.reshape(B, F, S, D)


def _run_s_path(x, pos_table, gamma, beta, out_dtype):
    """x: (L, S, D); returns (L, S, D)."""
    L, S, D = x.shape
    tile_bytes, vmem_bytes = _budgets()
    TL = _pick_s_tile(L, S, D, tile_bytes)
    grid = (pl.cdiv(L, TL),)

    return pl.pallas_call(
        _embed_ln_s_kernel,
        out_shape=jax.ShapeDtypeStruct((L, S, D), out_dtype),
        grid_spec=pltpu.PrefetchScalarGridSpec(
            num_scalar_prefetch=0,
            grid=grid,
            in_specs=[
                pl.BlockSpec((TL, S, D), lambda i: (i, 0, 0)),
                pl.BlockSpec((S, D), lambda i: (0, 0)),
                pl.BlockSpec((1, D), lambda i: (0, 0)),
                pl.BlockSpec((1, D), lambda i: (0, 0)),
            ],
            out_specs=pl.BlockSpec((TL, S, D), lambda i: (i, 0, 0)),
        ),
        compiler_params=pltpu.CompilerParams(
            dimension_semantics=("parallel",),
            vmem_limit_bytes=vmem_bytes),
    )(x, pos_table, gamma, beta)


def embedding_forward(x, batch_size, *, nb_seq, d_Em, num_of_features, Etype,
                      pos_embed_weight, ln_weight, ln_bias, out_dtype=None):
    """Pallas implementation of Embedding.forward.

    Etype == 'T':  x is (B, d_Em, num_of_features, nb_seq) -> out (B, F, S, D)
    otherwise:     x is (B, nb_seq, d_Em)                  -> out (B, S, D)
    `out_dtype` defaults to x.dtype (bf16 in/out supported; math stays f32).
    """
    del batch_size  # batch is taken from x.shape
    gamma = ln_weight.reshape(1, d_Em)
    beta = ln_bias.reshape(1, d_Em)
    out_dtype = x.dtype if out_dtype is None else out_dtype
    if Etype == 'T':
        return _run_t_path(x, pos_embed_weight, gamma, beta, out_dtype)
    return _run_s_path(x, pos_embed_weight, gamma, beta, out_dtype)


# --------------------------------------------------------------------------
# Demo / correctness check
# --------------------------------------------------------------------------

if __name__ == "__main__":
    key = jax.random.PRNGKey(0)

    batch_size = 2
    num_of_features = 4     # number of graph feature maps
    nb_seq = 8              # sequence length (position-embedding vocab)
    d_Em = 128              # embedding dim (LayerNorm dim); lane-dense

    k_pos, k_x = jax.random.split(key)

    # Deterministic parameter init (PyTorch defaults):
    #   nn.Embedding.weight ~ N(0, 1);  LayerNorm weight = 1, bias = 0.
    pos_embed_weight = jax.random.normal(k_pos, (nb_seq, d_Em), dtype=jnp.float32)
    ln_weight = jnp.ones((d_Em,), dtype=jnp.float32)
    ln_bias = jnp.zeros((d_Em,), dtype=jnp.float32)

    # ---- Etype == 'T' path: x is (B, d_Em, num_of_features, nb_seq) ----
    x = jax.random.normal(
        k_x, (batch_size, d_Em, num_of_features, nb_seq), dtype=jnp.float32)

    out = embedding_forward(
        x, batch_size,
        nb_seq=nb_seq, d_Em=d_Em, num_of_features=num_of_features, Etype='T',
        pos_embed_weight=pos_embed_weight, ln_weight=ln_weight, ln_bias=ln_bias)
    out = jax.block_until_ready(out)

    emb_ref = jnp.transpose(x, (0, 2, 3, 1)) + pos_embed_weight[None, None, :, :]
    mean = jnp.mean(emb_ref, axis=-1, keepdims=True)
    var = jnp.mean((emb_ref - mean) ** 2, axis=-1, keepdims=True)
    ref = (emb_ref - mean) / jnp.sqrt(var + 1e-5) * ln_weight + ln_bias
    assert out.shape == (batch_size, num_of_features, nb_seq, d_Em)
    assert jnp.allclose(out, ref, atol=1e-4, rtol=1e-4)

    # ---- Etype != 'T' path: x is (B, nb_seq, d_Em) ----
    x2 = jax.random.normal(jax.random.PRNGKey(1),
                           (batch_size, nb_seq, d_Em), dtype=jnp.float32)
    out2 = embedding_forward(
        x2, batch_size,
        nb_seq=nb_seq, d_Em=d_Em, num_of_features=num_of_features, Etype='S',
        pos_embed_weight=pos_embed_weight, ln_weight=ln_weight, ln_bias=ln_bias)
    out2 = jax.block_until_ready(out2)

    emb2 = x2 + pos_embed_weight[None, :, :]
    mean2 = jnp.mean(emb2, axis=-1, keepdims=True)
    var2 = jnp.mean((emb2 - mean2) ** 2, axis=-1, keepdims=True)
    ref2 = (emb2 - mean2) / jnp.sqrt(var2 + 1e-5) * ln_weight + ln_bias
    assert out2.shape == (batch_size, nb_seq, d_Em)
    assert jnp.allclose(out2, ref2, atol=1e-4, rtol=1e-4)

    print("KERNEL_OK")
</pallas_src>

<mosaic_0001>
module attributes {stable_mosaic.version = 11 : i64} {
  func.func @_embed_ln_t_kernel(%arg0: i32, %arg1: i32, %arg2: memref<1x128x32xf32, #tpu.memory_space<vmem>>, %arg3: memref<32x128xf32, #tpu.memory_space<vmem>>, %arg4: memref<1x128xf32, #tpu.memory_space<vmem>>, %arg5: memref<1x128xf32, #tpu.memory_space<vmem>>, %arg6: memref<1x32x128xf32, #tpu.memory_space<vmem>>) attributes {dimension_semantics = [#tpu.dimension_semantics<parallel>, #tpu.dimension_semantics<parallel>], iteration_bounds = array<i64: 1, 2>, scalar_prefetch = 0 : i64, scratch_operands = 0 : i64, tpu.core_type = #tpu.core_type<tc>, window_params = [{transform_indices = @transform_0, window_bounds = array<i64: 1, 128, 32>}, {transform_indices = @transform_1, window_bounds = array<i64: 32, 128>}, {pipeline_mode = #tpu.pipeline_mode<synchronous>, transform_indices = @transform_2, window_bounds = array<i64: 1, 128>}, {pipeline_mode = #tpu.pipeline_mode<synchronous>, transform_indices = @transform_3, window_bounds = array<i64: 1, 128>}, {transform_indices = @transform_4, window_bounds = array<i64: 1, 32, 128>}]} {
    %c0 = arith.constant 0 : index
    %c0_0 = arith.constant 0 : index
    %c0_1 = arith.constant 0 : index
    %0 = vector.load %arg2[%c0, %c0_0, %c0_1] : memref<1x128x32xf32, #tpu.memory_space<vmem>>, vector<1x128x32xf32>
    %1 = tpu.transpose %0, [0, 2, 1] : vector<1x128x32xf32> -> vector<1x32x128xf32>
    %c0_2 = arith.constant 0 : index
    %c0_3 = arith.constant 0 : index
    %2 = vector.load %arg3[%c0_2, %c0_3] : memref<32x128xf32, #tpu.memory_space<vmem>>, vector<32x128xf32>
    %3 = vector.shape_cast %2 : vector<32x128xf32> to vector<1x32x128xf32>
    %4 = arith.addf %1, %3 : vector<1x32x128xf32>
    %c0_4 = arith.constant 0 : index
    %c0_5 = arith.constant 0 : index
    %5 = vector.load %arg4[%c0_4, %c0_5] : memref<1x128xf32, #tpu.memory_space<vmem>>, vector<1x128xf32>
    %6 = vector.shape_cast %5 : vector<1x128xf32> to vector<1x1x128xf32>
    %c0_6 = arith.constant 0 : index
    %c0_7 = arith.constant 0 : index
    %7 = vector.load %arg5[%c0_6, %c0_7] : memref<1x128xf32, #tpu.memory_space<vmem>>, vector<1x128xf32>
    %8 = vector.shape_cast %7 : vector<1x128xf32> to vector<1x1x128xf32>
    %cst = arith.constant dense<0.000000e+00> : vector<1x32xf32>
    %9 = vector.multi_reduction <add>, %4, %cst [2] : vector<1x32x128xf32> to vector<1x32xf32>
    %10 = vector.shape_cast %9 : vector<1x32xf32> to vector<1x32x1xf32>
    %cst_8 = arith.constant 7.812500e-03 : f32
    %11 = vector.broadcast %cst_8 : f32 to vector<1x32x1xf32>
    %12 = arith.mulf %10, %11 : vector<1x32x1xf32>
    %13 = arith.mulf %4, %4 : vector<1x32x128xf32>
    %cst_9 = arith.constant dense<0.000000e+00> : vector<1x32xf32>
    %14 = vector.multi_reduction <add>, %13, %cst_9 [2] : vector<1x32x128xf32> to vector<1x32xf32>
    %15 = vector.shape_cast %14 : vector<1x32xf32> to vector<1x32x1xf32>
    %cst_10 = arith.constant 7.812500e-03 : f32
    %16 = vector.broadcast %cst_10 : f32 to vector<1x32x1xf32>
    %17 = arith.mulf %15, %16 : vector<1x32x1xf32>
    %18 = arith.mulf %12, %12 : vector<1x32x1xf32>
    %19 = arith.subf %17, %18 : vector<1x32x1xf32>
    %cst_11 = arith.constant 0.000000e+00 : f32
    %20 = vector.broadcast %cst_11 : f32 to vector<1x32x1xf32>
    %21 = arith.maximumf %19, %20 : vector<1x32x1xf32>
    %cst_12 = arith.constant 9.99999974E-6 : f32
    %22 = vector.broadcast %cst_12 : f32 to vector<1x32x1xf32>
    %23 = arith.addf %21, %22 : vector<1x32x1xf32>
    %24 = math.rsqrt %23 : vector<1x32x1xf32>
    %25 = vector.broadcast %12 : vector<1x32x1xf32> to vector<1x32x128xf32>
    %26 = arith.subf %4, %25 : vector<1x32x128xf32>
    %27 = vector.broadcast %24 : vector<1x32x1xf32> to vector<1x32x128xf32>
    %28 = arith.mulf %26, %27 : vector<1x32x128xf32>
    %29 = vector.broadcast %6 : vector<1x1x128xf32> to vector<1x32x128xf32>
    %30 = arith.mulf %28, %29 : vector<1x32x128xf32>
    %31 = vector.broadcast %8 : vector<1x1x128xf32> to vector<1x32x128xf32>
    %32 = arith.addf %30, %31 : vector<1x32x128xf32>
    %c0_13 = arith.constant 0 : index
    %c0_14 = arith.constant 0 : index
    %c0_15 = arith.constant 0 : index
    %33 = vector.load %arg6[%c0_13, %c0_14, %c0_15] : memref<1x32x128xf32, #tpu.memory_space<vmem>>, vector<1x32x128xf32>
    tpu.vector_store %arg6[%c0_13, %c0_14, %c0_15], %32 {strides = array<i32>} : memref<1x32x128xf32, #tpu.memory_space<vmem>>, vector<1x32x128xf32>,
    return
  }
  func.func @transform_0(%arg0: i32, %arg1: i32) -> (i32, i32, i32) {
    %c0_i32 = arith.constant 0 : i32
    %c0_i32_0 = arith.constant 0 : i32
    return %arg1, %c0_i32, %arg0 : i32, i32, i32
  }
  func.func @transform_1(%arg0: i32, %arg1: i32) -> (i32, i32) {
    %c0_i32 = arith.constant 0 : i32
    %c0_i32_0 = arith.constant 0 : i32
    return %arg0, %c0_i32 : i32, i32
  }
  func.func @transform_2(%arg0: i32, %arg1: i32) -> (i32, i32) {
    %c0_i32 = arith.constant 0 : i32
    %c0_i32_0 = arith.constant 0 : i32
    %c0_i32_1 = arith.constant 0 : i32
    return %c0_i32, %c0_i32_0 : i32, i32
  }
  func.func @transform_3(%arg0: i32, %arg1: i32) -> (i32, i32) {
    %c0_i32 = arith.constant 0 : i32
    %c0_i32_0 = arith.constant 0 : i32
    %c0_i32_1 = arith.constant 0 : i32
    return %c0_i32, %c0_i32_0 : i32, i32
  }
  func.func @transform_4(%arg0: i32, %arg1: i32) -> (i32, i32, i32) {
    %c0_i32 = arith.constant 0 : i32
    %c0_i32_0 = arith.constant 0 : i32
    return %arg1, %arg0, %c0_i32 : i32, i32, i32
  }
}

</mosaic_0001>

<bundles_post_ra>
// kernel: tpu_custom_call.1
= control target key start
LH: loop header
LB: loop body
LE: loop exit
PB: predicated region body
PF: predicated region fallthrough
CT: control target
= control target key end

     0   :  { %9 = vsyncpa [#allocation3], 0  ;;  %s853_s0 = inlined_call_operand.vmem [shape: f32[2,128,32], index: 0, kind: input, shape index: {}]   ;;  %s854_s1 = inlined_call_operand.vmem [shape: f32[32,128], index: 1, kind: input, shape index: {}]   ;;  %s855_s2 = inlined_call_operand.vmem [shape: f32[1,128], index: 2, kind: input, shape index: {}]   ;;  %s856_s3 = inlined_call_operand.vmem [shape: f32[1,128], index: 3, kind: input, shape index: {}]   ;;  %s857_s4 = inlined_call_operand.hbm [shape: f32[2,32,128], index: 4, kind: output, shape index: {}]  }
   0x1   :  { %11 = vsyncpa [#allocation3 + $0x1], 0  ;;  %s681_s15 = smov 0   ;;  %s683_s16 = smov 0  }
   0x2   :  { %s685_s17 = smov 0   ;;  %s687_s18 = smov 0  }
   0x3   :  { %s689_s19 = smov 0   ;;  %s691_s20 = smov 0  }
   0x4 LB: > { %s492_s21 = sadd.s32 4294967295, %s651_s20   ;;  %s493_s22 = sadd.s32 4294967294, %s651_s20   ;;  %s651_s20 = sphi %s691_s20, %s17_s20   ;;  %s647_s19 = sphi %s689_s19, %s864_s19   ;;  %s643_s18 = sphi %s687_s18, %s863_s18   ;;  %s639_s17 = sphi %s685_s17, %s862_s17   ;;  %s635_s16 = sphi %s683_s16, %s861_s16   ;;  %s631_s15 = sphi %s681_s15, %s860_s15  }
   0x5   : > { %s26_s23 = sadd.s32 1, %s647_s19  ;;  %s134_s24 = sadd.s32 1, %s639_s17 }
   0x6   : > { %p27_p0 = scmp.ge.s32.totalorder %s26_s23, 2  ;;  %p144_p1 = scmp.ne.s32.totalorder %s639_s17, %s635_s16 }
   0x7   : > { %p145_p2 = scmp.eq.s32.totalorder %s492_s21, 1  ;;  %p150_p3 = scmp.ne.s32.totalorder %s635_s16, %s631_s15 }
   0x8   : > { %s866_s23 = smov (%p27_p0, %s26_s23), 0  ;;  %p151_p5 = scmp.eq.s32.totalorder %s493_s22, 1 }
   0x9   : > { %p721_p4 = por %p145_p2, %p144_p1  ;;  %s129_s26 = ssub.s32 %s647_s19, %s866_s23 }
   0xa   : > { %p497_p6 = scmp.ge.s32.totalorder %s651_s20, 1  ;;  %p132_p7 = scmp.eq.s32.totalorder %s129_s26, 0 }
   0xb   : > { %p728_p8 = por %p151_p5, %p150_p3  ;;  %p195_p9 = scmp.lt.s32.totalorder %s651_s20, 3 }
   0xc   : > { %s734_s28 = scalar_select %p132_p7, %s639_s17, %s134_s24  }
   0xd   : > { %p196_p10 = pnand %p497_p6, %p195_p9 }
   0xe   : > { %p229_p11 = scmp.lt.s32.totalorder (!%p196_p10), %s643_s18, 1  ;;  %s226_s22 = sand.u32 (!%p196_p10), 1, %s635_s16  }
   0xf   : > { %199 = sbr.rel (%p196_p10) target bundleno = 360 (0x168), region = 36  ;;  %s808_s12 = scalar_lea.sflag (!%p196_p10), [#allocation3], %s226_s22 }
  0x14   : > { %s230_s29 = scalar_select %p229_p11, %s643_s18, 1  ;;  %v292_v16 = vld [vmem:[%s854_s1] sm:$0xff]  ;;  %v293_v19 = vld [vmem:[%s854_s1 + $0x8] sm:$0xff]  ;;  %v294_v23 = vld [vmem:[%s854_s1 + $0x10] sm:$0xff] }
  0x15   : > { %v295_v27 = vld [vmem:[%s854_s1 + $0x18] sm:$0xff]  ;;  %v501_v59 = vld [vmem:[%s855_s2] ss:$0 sm:$0xff] }
  0x16   : > { %s508_s30 = sshll.u32 %s230_s29, 7  ;;  %s498_s29 = sshll.u32 %s226_s22, 5  ;;  %v502_v62 = vld [vmem:[%s856_s3] ss:$0 sm:$0xff] }
  0x17   : > { %s741_s7 = scalar_lea.vmem %s853_s0, %s508_s30  ;;  %s228_s6 = scalar_lea.vmem [#allocation2], %s498_s29 }
  0x18   : > { %v244_v0 = vld [vmem:[%s741_s7] sm:$0xff]  ;;  %v245_v1 = vld [vmem:[%s741_s7 + $0x8] sm:$0xff]  ;;  %v246_v2 = vld [vmem:[%s741_s7 + $0x10] sm:$0xff]  ;;  %s398_s8 = sshll.u32 %s228_s6, 4  ;;  %s804_s8 = int_to_ptr.vmem [resolvable:$true] %s398_s8 }
  0x19   : > { %260 = vxpose.xlu0.b32.start [1/16] (narrow) %v244_v0, 32  ;;  %v247_v3 = vld [vmem:[%s741_s7 + $0x18] sm:$0xff]  ;;  %v248_v4 = vld [vmem:[%s741_s7 + $0x20] sm:$0xff]  ;;  %v249_v5 = vld [vmem:[%s741_s7 + $0x28] sm:$0xff]  ;;  %s575_s13 = scalar_lea.vmem %s804_s8, 512 }
  0x1a   : > { %v250_v6 = vld [vmem:[%s741_s7 + $0x30] sm:$0xff]  ;;  %v251_v7 = vld [vmem:[%s741_s7 + $0x38] sm:$0xff]  ;;  %v252_v8 = vld [vmem:[%s741_s7 + $0x40] sm:$0xff]  ;;  %p576_p12 = scmp.ne.s32.totalorder %s804_s8, %s575_s13 }
  0x1b   : > { %v253_v9 = vld [vmem:[%s741_s7 + $0x48] sm:$0xff]  ;;  %v254_v10 = vld [vmem:[%s741_s7 + $0x50] sm:$0xff]  ;;  %v255_v11 = vld [vmem:[%s741_s7 + $0x58] sm:$0xff] }
  0x1c   : > { %v256_v12 = vld [vmem:[%s741_s7 + $0x60] sm:$0xff]  ;;  %v257_v13 = vld [vmem:[%s741_s7 + $0x68] sm:$0xff]  ;;  %v258_v14 = vld [vmem:[%s741_s7 + $0x70] sm:$0xff]  ;;  %p577_p13 = pnand %p576_p12, %p721_p4 }
  0x1d   : > { %261 = vxpose.xlu0.b32.cont [2/16] (narrow) %v245_v1, 32  ;;  %v259_v15 = vld [vmem:[%s741_s7 + $0x78] sm:$0xff]  ;;  %s509_s7 = sshll.u32 %s643_s18, 9  ;;  %s653_s18 = smov [#allocation2]  }
  0x1e   : > { %s802_s11 = scalar_lea.hbm %s857_s4, %s509_s7  ;;  %p578_p0 = pneg %p577_p13 }
  0x1f   : > { %s579_s14 = sshll.u32 %s653_s18, 4  ;;  %s580_s14 = int_to_ptr.vmem [resolvable:$false] %s579_s14 }
  0x20   : > { %s581_s21 = scalar_lea.vmem %s580_s14, 1024  ;;  %p582_p1 = scmp.lt.s32.totalorder %s804_s8, %s580_s14 }
  0x21   : > { %262 = vxpose.xlu0.b32.cont [3/16] (narrow) %v246_v2, 32  ;;  %p583_p2 = scmp.lt.s32.totalorder %s581_s21, %s575_s13 }
  0x23   : > { %p584_p3 = por %p583_p2, %p582_p1 }
  0x25   : > { %263 = vxpose.xlu0.b32.cont [4/16] (narrow) %v247_v3, 32  ;;  %p585_p5 = pnand %p584_p3, %p578_p0 }
  0x29   : > { %264 = vxpose.xlu0.b32.cont [5/16] (narrow) %v248_v4, 32 }
  0x2d   : > { %265 = vxpose.xlu0.b32.cont [6/16] (narrow) %v249_v5, 32 }
  0x31   : > { %266 = vxpose.xlu0.b32.cont [7/16] (narrow) %v250_v6, 32 }
  0x35   : > { %267 = vxpose.xlu0.b32.cont [8/16] (narrow) %v251_v7, 32 }
  0x39   : > { %268 = vxpose.xlu0.b32.cont [9/16] (narrow) %v252_v8, 32 }
  0x3d   : > { %269 = vxpose.xlu0.b32.cont [10/16] (narrow) %v253_v9, 32 }
  0x41   : > { %270 = vxpose.xlu0.b32.cont [11/16] (narrow) %v254_v10, 32 }
  0x45   : > { %271 = vxpose.xlu0.b32.cont [12/16] (narrow) %v255_v11, 32 }
  0x49   : > { %272 = vxpose.xlu0.b32.cont [13/16] (narrow) %v256_v12, 32 }
  0x4d   : > { %273 = vxpose.xlu0.b32.cont [14/16] (narrow) %v257_v13, 32 }
  0x51   : > { %274 = vxpose.xlu0.b32.cont [15/16] (narrow) %v258_v14, 32 }
  0x55   : > { %275 = vxpose.xlu0.b32.end [16/16] (narrow) %v259_v15, 32 }
  0x95   : > { %v276_v17 = vpop.trf.xlu0 }
  0x96   : > { %v296_v18 = vadd.f32 %v292_v16, %v276_v17 }
  0x98   : > { %302 = vadd.xlane.f32.xlu1 %v296_v18  ;;  %v314_v21 = vmul.f32 %v296_v18, %v296_v18 }
  0x99   : > { %v277_v20 = vpop.trf.xlu0 }
  0x9a   : > { %v765_v22 = vadd.f32 %v293_v19, %v277_v20 }
  0x9c   : > { %318 = vadd.xlane.f32.xlu1 %v314_v21  ;;  %v315_v25 = vmul.f32 %v765_v22, %v765_v22 }
  0x9d   : > { %v278_v24 = vpop.trf.xlu0 }
  0x9e   : > { %v773_v26 = vadd.f32 %v294_v23, %v278_v24 }
  0xa0   : > { %304 = vadd.xlane.f32.xlu1 %v765_v22  ;;  %v316_v29 = vmul.f32 %v773_v26, %v773_v26 }
  0xa1   : > { %v279_v28 = vpop.trf.xlu0 }
  0xa2   : > { %v781_v30 = vadd.f32 %v295_v27, %v279_v28 }
  0xa4   : > { %320 = vadd.xlane.f32.xlu1 %v315_v25  ;;  %v317_v31 = vmul.f32 %v781_v30, %v781_v30 }
  0xa8   : > { %306 = vadd.xlane.f32.xlu1 %v773_v26 }
  0xac   : > { %322 = vadd.xlane.f32.xlu1 %v316_v29 }
  0xb0   : > { %308 = vadd.xlane.f32.xlu1 %v781_v30 }
  0xb4   : > { %324 = vadd.xlane.f32.xlu1 %v317_v31 }
 0x121   : > { %v303_v32 = vpop.xlane.xlu1 %302 }
 0x122   : > { %v310_v33 = vmul.f32 0.0078125, %v303_v32 }
 0x124   : > { %v330_v35 = vmul.f32 %v310_v33, %v310_v33  ;;  %v350_v55 = vsub.f32 %v296_v18, %v310_v33 }
 0x125   : > { %v319_v34 = vpop.xlane.xlu1 %318 }
 0x126   : > { %v326_v36 = vmul.f32 0.0078125, %v319_v34 }
 0x128   : > { %v334_v37 = vsub.f32 %v326_v36, %v330_v35 }
 0x129   : > { %v305_v38 = vpop.xlane.xlu1 %304 }
 0x12a   : > { %v338_v39 = vmax.f32 %v334_v37, 0.0  ;;  %v311_v40 = vmul.f32 0.0078125, %v305_v38 }
 0x12c   : > { %v342_v41 = vadd.f32 1e-05, %v338_v39  ;;  %v331_v43 = vmul.f32 %v311_v40, %v311_v40  ;;  %v351_v5 = vsub.f32 %v765_v22, %v311_v40 }
 0x12d   : > { %v321_v42 = vpop.xlane.xlu1 %320 }
 0x12e   : > { %567 = vrsqrt.f32 %v342_v41  ;;  %v327_v44 = vmul.f32 0.0078125, %v321_v42 }
 0x130   : > { %v335_v45 = vsub.f32 %v327_v44, %v331_v43 }
 0x131   : > { %v307_v46 = vpop.xlane.xlu1 %306 }
 0x132   : > { %v339_v47 = vmax.f32 %v335_v45, 0.0  ;;  %v312_v48 = vmul.f32 0.0078125, %v307_v46 }
 0x134   : > { %v343_v49 = vadd.f32 1e-05, %v339_v47  ;;  %v332_v51 = vmul.f32 %v312_v48, %v312_v48  ;;  %v352_v12 = vsub.f32 %v773_v26, %v312_v48 }
 0x135   : > { %v323_v50 = vpop.xlane.xlu1 %322 }
 0x136   : > { %569 = vrsqrt.f32 %v343_v49  ;;  %v328_v52 = vmul.f32 0.0078125, %v323_v50 }
 0x138   : > { %v336_v53 = vsub.f32 %v328_v52, %v332_v51 }
 0x139   : > { %v309_v54 = vpop.xlane.xlu1 %308 }
 0x13a   : > { %v340_v56 = vmax.f32 %v336_v53, 0.0  ;;  %v313_v57 = vmul.f32 0.0078125, %v309_v54 }
 0x13b   : > { %v568_v58 = vpop.eup %567 }
 0x13c   : > { %v354_v60 = vmul.f32 %v568_v58, %v350_v55  ;;  %v344_v61 = vadd.f32 1e-05, %v340_v56  ;;  %v333_v1 = vmul.f32 %v313_v57, %v313_v57  ;;  %v353_v17 = vsub.f32 %v781_v30, %v313_v57 }
 0x13d   : > { %v325_v63 = vpop.xlane.xlu1 %324 }
 0x13e   : > { %v364_v0 = vmul.f32 %v501_v59, %v354_v60  ;;  %571 = vrsqrt.f32 %v344_v61  ;;  %v329_v2 = vmul.f32 0.0078125, %v325_v63 }
 0x140   : > { %v337_v3 = vsub.f32 %v329_v2, %v333_v1  ;;  %v374_v4 = vadd.f32 %v502_v62, %v364_v0 }
 0x142   : > { %v341_v6 = vmax.f32 %v337_v3, 0.0  ;;  %378 = vst [vmem:[%s228_s6] sm:$0xff] %v374_v4 }
 0x143   : > { %v570_v7 = vpop.eup %569 }
 0x144   : > { %v355_v8 = vmul.f32 %v570_v7, %v351_v5  ;;  %v345_v9 = vadd.f32 1e-05, %v341_v6 }
 0x146   : > { %v365_v10 = vmul.f32 %v501_v59, %v355_v8  ;;  %573 = vrsqrt.f32 %v345_v9 }
 0x148   : > { %v375_v11 = vadd.f32 %v502_v62, %v365_v10 }
 0x14a   : > { %379 = vst [vmem:[%s228_s6 + $0x8] sm:$0xff] %v375_v11 }
 0x14b   : > { %v572_v13 = vpop.eup %571 }
 0x14c   : > { %v356_v14 = vmul.f32 %v572_v13, %v352_v12 }
 0x14e   : > { %v366_v15 = vmul.f32 %v501_v59, %v356_v14 }
 0x150   : > { %v376_v16 = vadd.f32 %v502_v62, %v366_v15 }
 0x152   : > { %380 = vst [vmem:[%s228_s6 + $0x10] sm:$0xff] %v376_v16 }
 0x153   : > { %v574_v18 = vpop.eup %573 }
 0x154   : > { %v357_v19 = vmul.f32 %v574_v18, %v353_v17 }
 0x156   : > { %v367_v20 = vmul.f32 %v501_v59, %v357_v19 }
 0x158   : > { %v377_v21 = vadd.f32 %v502_v62, %v367_v20 }
 0x15a   : > { %381 = vst [vmem:[%s228_s6 + $0x18] sm:$0xff] %v377_v21 }
 0x15b   : > { %588 = shalt.err (!%p585_p5)
}
 0x15c   : > { %s589_s22 = scalar_lea.hbm %s802_s11, 512  ;;  %s593_s29 = scalar_lea.hbm %s857_s4, 1024 }
 0x15d   : > { %p590_p6 = scmp.ne.s32.totalorder %s802_s11, %s589_s22  ;;  %p594_p10 = scmp.lt.s32.totalorder %s802_s11, %s857_s4 }
 0x15e   : > { %p595_p11 = scmp.lt.s32.totalorder %s593_s29, %s589_s22 }
 0x15f   : > { %p591_p7 = pnand %p590_p6, %p721_p4 }
 0x160   : > { %p596_p12 = por %p595_p11, %p594_p10 }
 0x161   : > { %p592_p9 = pneg %p591_p7 }
 0x163   : > { %p597_p13 = pnand %p596_p12, %p592_p9 }
 0x165   : > { %600 = shalt.err (!%p597_p13)
}
 0x166   : > { %s654_s6 = smov 128   ;;  %s655_s7 = smov 8  }
 0x167   : > { %510 = dma.vmem_to_hbm [thread:$0]  (%p721_p4), %s804_s8, 512, %s802_s11, %s808_s12, %s654_s6, %s654_s6, %s655_s7  }
 0x168 PF: > { %p516_p0 = scmp.ge.s32.totalorder %s651_s20, 2  ;;  %s413_s9 = sand.u32 1, %s631_s15  }
 0x169   : > { %s414_s10 = scalar_lea.sflag [#allocation3], %s413_s9 }
 0x16a   : > { %p513_p1 = pnand %p516_p0, %p728_p8 }
 0x16c   : > { %p514_p2 = pneg %p513_p1 }
 0x16e   : > { %626 = dma.done.wait (%p514_p2), %s414_s10, 512  }
 0x16f   : > { %628 = vsyncadd (%p514_p2), %s414_s10, 4294966784  ;;  %s17_s20 = sadd.s32 1, %s651_s20   ;;  %s860_s15 = smov %s635_s16 }
 0x170   : > { %p14_p3 = scmp.ge.s32.totalorder %s17_s20, 4   ;;  %s861_s16 = smov %s639_s17 }
 0x171   : > { %s862_s17 = smov %s734_s28  ;;  %s863_s18 = smov %s647_s19 }
 0x172   : > { %s864_s19 = smov %s866_s23  ;;  %16 = sbr.rel (!%p14_p3) target bundleno = 4 (0x4), region = 74 }
 0x177   :  { %419 = vsyncpa [#allocation3], 1 }
 0x178   :  { %421 = vsyncpa [#allocation3 + $0x1], 1 }

</bundles_post_ra>
